<compile_context>
chip_gen: v5e
topology: v5e:2x2
jax: 0.10.0
libtpu: 0.0.40
codegen_flags: <defaults>
</compile_context>

<pallas_src>
import jax
import jax.numpy as jnp
from jax.experimental import pallas as pl
from jax.experimental.pallas import tpu as pltpu

LANES = 128
TARGET_TILE_ROWS = 2048  # ~1 MiB / f32 buffer; 4 MiB double-buffered (fits all scoped-VMEM defaults)


def _snake_kernel(scalars_ref, x_ref, o_ref):
    # scalars_ref: SMEM (2,) f32 -> [alpha, 1/alpha]
    # x_ref / o_ref: VMEM (tile_rows, 128)
    a = scalars_ref[0]
    inv_a = scalars_ref[1]
    x = x_ref[...]
    xf = x.astype(jnp.float32)          # compute transcendental in f32 (bf16-safe, v5e-safe)
    s = jnp.sin(a * xf)
    y = xf + inv_a * (s * s)
    o_ref[...] = y.astype(o_ref.dtype)


def snake(x, alpha):
    """Snake activation. x: any shape (e.g. NCHW); alpha: scalar parameter (or shape (1,))."""
    orig_shape = x.shape
    orig_dtype = x.dtype

    flat = x.reshape(-1)
    n = flat.shape[0]

    # Pad only to a multiple of 128 lanes (not a full tile) -> usually a no-op.
    pad = (-n) % LANES
    if pad:
        flat = jnp.pad(flat, (0, pad))
    rows = flat.shape[0] // LANES
    x2d = flat.reshape(rows, LANES)

    if rows <= TARGET_TILE_ROWS:
        # Single block covering the whole array (block == full dim, so no
        # (8,128) divisibility requirement on the row count).
        tile_rows = rows
    else:
        # 2048 is a multiple of every sublane packing (8 f32 / 16 bf16 / 32 int8).
        tile_rows = TARGET_TILE_ROWS

    grid = (pl.cdiv(rows, tile_rows),)  # ragged last block handled by Pallas masked stores

    # Hoist alpha and 1/alpha to SMEM scalars (computed once on host).
    # NOTE: matches the PyTorch module exactly (no epsilon added to alpha).
    a32 = jnp.asarray(alpha, dtype=jnp.float32).reshape(())
    scalars = jnp.stack([a32, 1.0 / a32])

    out2d = pl.pallas_call(
        _snake_kernel,
        out_shape=jax.ShapeDtypeStruct((rows, LANES), x2d.dtype),
        grid=grid,
        in_specs=[
            pl.BlockSpec(memory_space=pltpu.SMEM),                    # [alpha, 1/alpha]
            pl.BlockSpec((tile_rows, LANES), lambda i: (i, 0)),       # streaming input tile
        ],
        out_specs=pl.BlockSpec((tile_rows, LANES), lambda i: (i, 0)),  # lane-dense output tile
        compiler_params=pltpu.CompilerParams(
            dimension_semantics=("parallel",),
        ),
    )(scalars, x2d)

    out = out2d.reshape(-1)
    if pad:
        out = out[:n]
    return out.reshape(orig_shape).astype(orig_dtype)


if __name__ == "__main__":
    key = jax.random.PRNGKey(0)
    # NCHW input, small shapes: batch=2, channels=4, H=W=16
    x = jax.random.normal(key, (2, 4, 16, 16), dtype=jnp.float32)

    # Matches nn.Parameter(torch.Tensor([1.0]))
    alpha = jnp.array([1.0], dtype=jnp.float32)

    y = snake(x, alpha)
    y = jax.block_until_ready(y)

    # Reference check in plain JAX
    y_ref = x + (1.0 / alpha) * jnp.sin(alpha * x) ** 2
    assert y.shape == x.shape
    assert jnp.allclose(y, y_ref, atol=1e-5, rtol=1e-5), "mismatch vs reference"

    # Also exercise a larger, ragged (non-tile-multiple) size to hit the
    # multi-block + ragged-last-block path.
    x_big = jax.random.normal(jax.random.PRNGKey(1), (3, 7, 33, 129), dtype=jnp.float32)
    y_big = jax.block_until_ready(snake(x_big, alpha))
    y_big_ref = x_big + (1.0 / alpha) * jnp.sin(alpha * x_big) ** 2
    assert jnp.allclose(y_big, y_big_ref, atol=1e-5, rtol=1e-5), "mismatch vs reference (big)"

    print("KERNEL_OK")
</pallas_src>

<mosaic_0001>
module attributes {stable_mosaic.version = 11 : i64} {
  func.func @_snake_kernel(%arg0: i32, %arg1: memref<2xf32, #tpu.memory_space<smem>>, %arg2: memref<16x128xf32, #tpu.memory_space<vmem>>, %arg3: memref<16x128xf32, #tpu.memory_space<vmem>>) attributes {dimension_semantics = [#tpu.dimension_semantics<parallel>], iteration_bounds = array<i64: 1>, scalar_prefetch = 0 : i64, scratch_operands = 0 : i64, tpu.core_type = #tpu.core_type<tc>, window_params = [{transform_indices = @transform_0, window_bounds = array<i64: 2>}, {transform_indices = @transform_1, window_bounds = array<i64: 16, 128>}, {transform_indices = @transform_2, window_bounds = array<i64: 16, 128>}]} {
    %c0 = arith.constant 0 : index
    %0 = memref.load %arg1[%c0] : memref<2xf32, #tpu.memory_space<smem>>
    %c1 = arith.constant 1 : index
    %1 = memref.load %arg1[%c1] : memref<2xf32, #tpu.memory_space<smem>>
    %c0_0 = arith.constant 0 : index
    %c0_1 = arith.constant 0 : index
    %2 = vector.load %arg2[%c0_0, %c0_1] : memref<16x128xf32, #tpu.memory_space<vmem>>, vector<16x128xf32>
    %3 = vector.broadcast %0 : f32 to vector<16x128xf32>
    %4 = arith.mulf %3, %2 : vector<16x128xf32>
    %5 = math.sin %4 : vector<16x128xf32>
    %6 = arith.mulf %5, %5 : vector<16x128xf32>
    %7 = vector.broadcast %1 : f32 to vector<16x128xf32>
    %8 = arith.mulf %7, %6 : vector<16x128xf32>
    %9 = arith.addf %2, %8 : vector<16x128xf32>
    %c0_2 = arith.constant 0 : index
    %c0_3 = arith.constant 0 : index
    %10 = vector.load %arg3[%c0_2, %c0_3] : memref<16x128xf32, #tpu.memory_space<vmem>>, vector<16x128xf32>
    tpu.vector_store %arg3[%c0_2, %c0_3], %9 {strides = array<i32>} : memref<16x128xf32, #tpu.memory_space<vmem>>, vector<16x128xf32>,
    return
  }
  func.func @transform_0(%arg0: i32) -> i32 {
    %c0_i32 = arith.constant 0 : i32
    %c0_i32_0 = arith.constant 0 : i32
    return %c0_i32 : i32
  }
  func.func @transform_1(%arg0: i32) -> (i32, i32) {
    %c0_i32 = arith.constant 0 : i32
    %c0_i32_0 = arith.constant 0 : i32
    return %arg0, %c0_i32 : i32, i32
  }
  func.func @transform_2(%arg0: i32) -> (i32, i32) {
    %c0_i32 = arith.constant 0 : i32
    %c0_i32_0 = arith.constant 0 : i32
    return %arg0, %c0_i32 : i32, i32
  }
}

</mosaic_0001>

<bundles_post_ra>
// kernel: tpu_custom_call.1
= control target key start
LH: loop header
LB: loop body
LE: loop exit
PB: predicated region body
PF: predicated region fallthrough
CT: control target
= control target key end

     0   :  { %7 = vsyncpa [#allocation5], 0  ;;  %s698_s0 = inlined_call_operand.hbm [shape: f32[2], index: 0, kind: input, shape index: {}]   ;;  %s699_s1 = inlined_call_operand.hbm [shape: f32[16,128], index: 1, kind: input, shape index: {}]   ;;  %s700_s2 = inlined_call_operand.hbm [shape: f32[16,128], index: 2, kind: output, shape index: {}]  }
   0x1   :  { %8 = vsyncpa [#allocation3], 0 }
   0x2   :  { %9 = vsyncpa [#allocation4], 0  ;;  %s15_s11 = sshll.u32 %s698_s0, 4  ;;  %s23_s14 = sshll.u32 %s699_s1, 4  ;;  %s16_s11 = int_to_ptr.hbm [resolvable:$true] %s15_s11  ;;  %s24_s14 = int_to_ptr.hbm [resolvable:$true] %s23_s14 }
   0x3   :  { %s472_s15 = smov [#allocation2]   ;;  %s473_s16 = smov [#allocation6]  }
   0x4   :  { %18 = dma.hbm_to_smem %s16_s11, 16, %s472_s15, [#allocation5]  }
   0x5   :  { %s25_s17 = sshll.u32 %s473_s16, 4  ;;  %s474_s18 = smov 128   ;;  %s26_s17 = int_to_ptr.vmem [resolvable:$true] %s25_s17 }
   0x6   :  { %s475_s19 = smov 8  }
   0x7   :  { %31 = dma.hbm_to_vmem [thread:$0]  %s24_s14, 256, %s26_s17, [#allocation3], %s474_s18, %s474_s18, %s475_s19  }
   0x8   :  { %466 = dma.done.wait [#allocation5], 16  }
   0x9   :  { %467 = vsyncadd [#allocation5], 4294967280 }
   0xa   :  { %468 = dma.done.wait [#allocation3], 256  }
   0xb   :  { %469 = vsyncadd [#allocation3], 4294967040 }
   0xc   :  { %40 = sfence }
   0xd   :  { %s41_s0 = sld [smem:[#allocation2]]  ;;  %v508_v0 = vld [vmem:[#allocation6] sm:$0xff]  ;;  %v510_v1 = vld [vmem:[#allocation6 + $0x8] sm:$0xff]  ;;  %v476_v26 = vmov 683565275   ;;  %s483_s20 = smov [#allocation7]  }
   0xe   :  { %v477_v28 = vmov 2475754826   ;;  %v478_v30 = vmov 2131351028   ;;  %v479_v32 = vmov 2102212464  }
   0xf   :  { %v480_v34 = vmov 920167782   ;;  %v481_v43 = vmov 1326507024   ;;  %s671_s1 = sld [smem:[#allocation2 + $0x1]]  ;;  %s371_s21 = sshll.u32 %s483_s20, 4  ;;  %s372_s21 = int_to_ptr.vmem [resolvable:$true] %s371_s21 }
  0x10   :  { %s373_s24 = sshll.u32 %s700_s2, 4  ;;  %s374_s24 = int_to_ptr.hbm [resolvable:$true] %s373_s24 }
  0x13   :  { %v45_v2 = vstv %s41_s0 }
  0x14   :  { %v513_v3 = vmul.f32 %v45_v2, %v508_v0  ;;  %v516_v4 = vmul.f32 %v45_v2, %v510_v1 }
  0x16   :  { %v48_v5 = vand.u32 2147483647, %v513_v3  ;;  %v51_v6 = vand.u32 2139095040, %v513_v3  ;;  %v203_v7 = vand.u32 2147483647, %v516_v4  ;;  %v206_v8 = vand.u32 2139095040, %v516_v4 }
  0x18   :  { %v52_v9 = vshrl.u32 %v51_v6, 23  ;;  %v55_v10 = vand.u32 8388607, %v48_v5  ;;  %v207_v11 = vshrl.u32 %v206_v8, 23  ;;  %v210_v15 = vand.u32 8388607, %v203_v7 }
  0x1a   :  { %v388_v12 = vadd.s32 4294967169, %v52_v9  ;;  %v56_v13 = vor.u32 8388608, %v55_v10  ;;  %v391_v14 = vadd.s32 4294967169, %v207_v11  ;;  %v211_v20 = vor.u32 8388608, %v210_v15 }
  0x1c   :  { %v58_v16 = vadd.s32 1, %v388_v12  ;;  %v213_v17 = vadd.s32 1, %v391_v14  ;;  %v526_v19 = vshll.u32 %v56_v13, 8  ;;  %v536_v37 = vshll.u32 %v211_v20, 8 }
  0x1e   :  { %vm59_vm0 = vcmp.gt.s32.totalorder %v58_v16, 0  ;;  %vm214_vm1 = vcmp.gt.s32.totalorder %v213_v17, 0  ;;  %v97_v36 = vand.u32 65535, %v526_v19  ;;  %v98_v41 = vshrl.u32 %v526_v19, 16 }
  0x1f   :  { %v60_v18 = vsel %vm59_vm0, %v58_v16, 0  ;;  %v215_v22 = vsel %vm214_vm1, %v213_v17, 0 }
  0x20   :  { %v62_v21 = vand.u32 31, %v60_v18  ;;  %v528_v23 = vshrl.u32 %v60_v18, 5  ;;  %v530_v24 = vand.u32 31, %v215_v22  ;;  %v554_v54 = vshrl.u32 %v215_v22, 5 }
  0x22   :  { %v63_v25 = vsub.s32 32, %v62_v21  ;;  %v65_v27 = vshll.u32 %v476_v26, %v62_v21  ;;  %v68_v29 = vshll.u32 %v477_v28, %v62_v21  ;;  %v71_v31 = vshll.u32 %v478_v30, %v62_v21 }
  0x23   :  { %v74_v33 = vshll.u32 %v479_v32, %v62_v21  ;;  %v77_v35 = vshll.u32 %v480_v34, %v62_v21  ;;  %vm80_vm2 = vcmp.lt.s32.totalorder %v528_v23, 1  ;;  %vm83_vm3 = vcmp.lt.s32.totalorder %v528_v23, 4 }
  0x24   :  { %v66_v38 = vshrl.u32 %v477_v28, %v63_v25  ;;  %v69_v39 = vshrl.u32 %v478_v30, %v63_v25  ;;  %v72_v40 = vshrl.u32 %v479_v32, %v63_v25  ;;  %v75_v42 = vshrl.u32 %v480_v34, %v63_v25 }
  0x25   :  { %v78_v44 = vshrl.u32 %v481_v43, %v63_v25  ;;  %v545_v48 = vsub.s32 32, %v530_v24  ;;  %v64_v49 = vshrl.u32 %v476_v26, %v63_v25  ;;  %vm82_vm4 = vcmp.lt.s32.totalorder %v528_v23, 3 }
  0x26   :  { %v67_v45 = vor.u32 %v66_v38, %v65_v27  ;;  %v70_v46 = vor.u32 %v69_v39, %v68_v29  ;;  %v73_v47 = vor.u32 %v72_v40, %v71_v31  ;;  %v76_v50 = vor.u32 %v75_v42, %v74_v33 }
  0x27   :  { %v79_v51 = vor.u32 %v78_v44, %v77_v35  ;;  %vm81_vm5 = vcmp.lt.s32.totalorder %v528_v23, 2  ;;  %v220_v57 = vshll.u32 %v476_v26, %v530_v24  ;;  %v223_v58 = vshll.u32 %v477_v28, %v530_v24 }
  0x28   :  { %v88_v52 = vsel %vm80_vm2, %v67_v45, %v70_v46  ;;  %v92_v53 = vsel %vm80_vm2, %v70_v46, %v73_v47  ;;  %v89_v55 = vsel %vm83_vm3, %v76_v50, 920167782  ;;  %v85_v59 = vsel %vm83_vm3, %v73_v47, 2102212464 }
  0x29   :  { %v93_v56 = vsel %vm83_vm3, %v79_v51, 1326507024  ;;  %v90_v60 = vsel %vm82_vm4, %v73_v47, %v89_v55  ;;  %v221_v62 = vshrl.u32 %v477_v28, %v545_v48  ;;  %v84_v63 = vsel %vm80_vm2, %v64_v49, %v67_v45 }
  0x2a   :  { %v94_v61 = vsel %vm82_vm4, %v76_v50, %v93_v56  ;;  %v91_v2 = vsel %vm81_vm5, %v88_v52, %v90_v60  ;;  %v224_v8 = vshrl.u32 %v478_v30, %v545_v48  ;;  %v86_v13 = vsel %vm82_vm4, %v70_v46, %v85_v59 }
  0x2b   :  { %v95_v6 = vsel %vm81_vm5, %v92_v53, %v94_v61  ;;  %v121_v11 = vand.u32 65535, %v91_v2  ;;  %v122_v12 = vshrl.u32 %v91_v2, 16  ;;  %v579_v14 = vor.u32 %v221_v62, %v220_v57 }
  0x2c   :  { %v99_v9 = vand.u32 65535, %v95_v6  ;;  %v100_v10 = vshrl.u32 %v95_v6, 16  ;;  %v581_v15 = vor.u32 %v224_v8, %v223_v58  ;;  %v226_v16 = vshll.u32 %v478_v30, %v530_v24 }
  0x2d   :  { %v227_v21 = vshrl.u32 %v479_v32, %v545_v48  ;;  %v123_v25 = vmul.u32 %v121_v11, %v97_v36  ;;  %v124_v27 = vmul.u32 %v122_v12, %v97_v36  ;;  %v125_v28 = vmul.u32 %v121_v11, %v98_v41 }
  0x2e   :  { %v101_v17 = vmul.u32 %v99_v9, %v97_v36  ;;  %v102_v18 = vmul.u32 %v100_v10, %v97_v36  ;;  %v103_v20 = vmul.u32 %v99_v9, %v98_v41  ;;  %v104_v22 = vmul.u32 %v100_v10, %v98_v41 }
  0x2f   :  { %v126_v35 = vmul.u32 %v122_v12, %v98_v41  ;;  %v127_v39 = vshll.u32 %v124_v27, 16  ;;  %v128_v40 = vshrl.u32 %v124_v27, 16  ;;  %v129_v42 = vshll.u32 %v125_v28, 16 }
  0x30   :  { %v105_v29 = vshll.u32 %v102_v18, 16  ;;  %v106_v31 = vshrl.u32 %v102_v18, 16  ;;  %v107_v33 = vshll.u32 %v103_v20, 16  ;;  %v108_v38 = vshrl.u32 %v103_v20, 16 }
  0x31   :  { %v130_v44 = vshrl.u32 %v125_v28, 16  ;;  %v229_v45 = vshll.u32 %v479_v32, %v530_v24  ;;  %v482_v46 = vmov 0   ;;  %vm131_vm7 = vc.u32 %v123_v25, %v127_v39 }
  0x32   :  { %vm109_vm6 = vc.u32 %v101_v17, %v105_v29  ;;  %v111_v30 = vadd.s32 %v105_v29, %v101_v17  ;;  %v133_v36 = vadd.s32 %v127_v39, %v123_v25  ;;  %v230_v49 = vshrl.u32 %v480_v34, %v545_v48 }
  0x33   :  { %v110_v47 = vsel %vm109_vm6, 1, %v482_v46  ;;  %v132_v41 = vsel %vm131_vm7, 1, %v482_v46  ;;  %v232_v51 = vshll.u32 %v480_v34, %v530_v24  ;;  %v228_v32 = vor.u32 %v227_v21, %v226_v16 }
  0x34   :  { %v112_v50 = vadd.s32 %v110_v47, %v104_v22  ;;  %vm113_vm8 = vc.u32 %v111_v30, %v107_v33  ;;  %v134_v53 = vadd.s32 %v132_v41, %v126_v35  ;;  %vm135_vm9 = vc.u32 %v133_v36, %v129_v42 }
  0x35   :  { %v114_v52 = vsel %vm113_vm8, 1, %v482_v46  ;;  %v136_v56 = vsel %vm135_vm9, 1, %v482_v46  ;;  %v231_v57 = vor.u32 %v230_v49, %v229_v45  ;;  %v233_v58 = vshrl.u32 %v481_v43, %v545_v48 }
  0x36   :  { %v116_v55 = vadd.s32 %v114_v52, %v112_v50  ;;  %v598_v59 = vadd.s32 %v133_v36, %v129_v42  ;;  %v138_v60 = vadd.s32 %v136_v56, %v134_v53  ;;  %vm235_vm10 = vcmp.lt.s32.totalorder %v554_v54, 1 }
  0x37   :  { %vm237_vm11 = vcmp.lt.s32.totalorder %v554_v54, 3  ;;  %v234_v34 = vor.u32 %v233_v58, %v232_v51  ;;  %vm236_vm12 = vcmp.lt.s32.totalorder %v554_v54, 2  ;;  %vm238_vm13 = vcmp.lt.s32.totalorder %v554_v54, 4 }
  0x38   :  { %v117_v24 = vadd.s32 %v116_v55, %v106_v31  ;;  %v87_v61 = vsel %vm81_vm5, %v84_v63, %v86_v13  ;;  %v139_v62 = vadd.s32 %v138_v60, %v128_v40  ;;  %v243_v43 = vsel %vm235_vm10, %v579_v14, %v581_v15 }
  0x39   :  { %v244_v2 = vsel %vm238_vm13, %v231_v57, 920167782  ;;  %v247_v9 = vsel %vm235_vm10, %v581_v15, %v228_v32  ;;  %v252_v23 = vand.u32 65535, %v536_v37  ;;  %v248_v11 = vsel %vm238_vm13, %v234_v34, 1326507024 }
  0x3a   :  { %v612_v6 = vadd.s32 %v117_v24, %v108_v38  ;;  %v245_v8 = vsel %vm237_vm11, %v228_v32, %v244_v2  ;;  %v140_v63 = vadd.s32 %v139_v62, %v130_v44  ;;  %v253_v12 = vshrl.u32 %v536_v37, 16 }
  0x3b   :  { %v246_v10 = vsel %vm236_vm12, %v243_v43, %v245_v8  ;;  %v141_v13 = vmul.u32 %v526_v19, %v87_v61  ;;  %v249_v16 = vsel %vm237_vm11, %v231_v57, %v248_v11  ;;  %v219_v28 = vshrl.u32 %v476_v26, %v545_v48 }
  0x3c   :  { %vm143_vm14 = vc.u32 %v612_v6, %v598_v59  ;;  %v276_v17 = vand.u32 65535, %v246_v10  ;;  %v144_v18 = vadd.s32 1, %v140_v63  ;;  %v250_v20 = vsel %vm236_vm12, %v247_v9, %v249_v16 }
  0x3d   :  { %v277_v21 = vshrl.u32 %v246_v10, 16  ;;  %v254_v22 = vand.u32 65535, %v250_v20  ;;  %v255_v25 = vshrl.u32 %v250_v20, 16  ;;  %v240_v30 = vsel %vm238_vm13, %v228_v32, 2102212464 }
  0x3e   :  { %v145_v27 = vsel %vm143_vm14, %v144_v18, %v140_v63  ;;  %v280_v19 = vmul.u32 %v276_v17, %v253_v12  ;;  %v278_v38 = vmul.u32 %v276_v17, %v252_v23  ;;  %v239_v47 = vsel %vm235_vm10, %v219_v28, %v579_v14 }
  0x3f   :  { %v279_v29 = vmul.u32 %v277_v21, %v252_v23  ;;  %v146_v31 = vadd.s32 %v145_v27, %v141_v13  ;;  %v256_v33 = vmul.u32 %v254_v22, %v252_v23  ;;  %v257_v35 = vmul.u32 %v255_v25, %v252_v23 }
  0x40   :  { %v258_v39 = vmul.u32 %v254_v22, %v253_v12  ;;  %v259_v44 = vmul.u32 %v255_v25, %v253_v12  ;;  %v281_v26 = vmul.u32 %v277_v21, %v253_v12  ;;  %v284_v48 = vshll.u32 %v280_v19, 16 }
  0x41   :  { %v282_v40 = vshll.u32 %v279_v29, 16  ;;  %v147_v42 = vadd.s32 536870912, %v146_v31  ;;  %v260_v45 = vshll.u32 %v257_v35, 16  ;;  %v241_v41 = vsel %vm237_vm11, %v581_v15, %v240_v30 }
  0x42   :  { %v262_v36 = vshll.u32 %v258_v39, 16  ;;  %v261_v14 = vshrl.u32 %v257_v35, 16  ;;  %v283_v57 = vshrl.u32 %v279_v29, 16  ;;  %v263_v24 = vshrl.u32 %v258_v39, 16 }
  0x43   :  { %v639_v49 = vshrl.u32 %v147_v42, 30  ;;  %vm264_vm15 = vc.u32 %v256_v33, %v260_v45  ;;  %v266_v50 = vadd.s32 %v260_v45, %v256_v33  ;;  %vm286_vm0 = vc.u32 %v278_v38, %v282_v40 }
  0x44   :  { %v265_v51 = vsel %vm264_vm15, 1, %v482_v46  ;;  %v287_v52 = vsel %vm286_vm0, 1, %v482_v46  ;;  %v288_v53 = vadd.s32 %v282_v40, %v278_v38  ;;  %v285_v61 = vshrl.u32 %v280_v19, 16 }
  0x45   :  { %v149_v32 = vshll.u32 %v639_v49, 30  ;;  %v267_v55 = vadd.s32 %v265_v51, %v259_v44  ;;  %vm268_vm1 = vc.u32 %v266_v50, %v262_v36  ;;  %v289_v58 = vadd.s32 %v287_v52, %v281_v26 }
  0x46   :  { %v269_v56 = vsel %vm268_vm1, 1, %v482_v46  ;;  %vm290_vm2 = vc.u32 %v288_v53, %v284_v48  ;;  %v292_v8 = vadd.s32 %v288_v53, %v284_v48  ;;  %v242_v9 = vsel %vm236_vm12, %v239_v47, %v241_v41 }
  0x47   :  { %v150_v60 = vsub.s32 %v146_v31, %v149_v32  ;;  %v271_v34 = vadd.s32 %v269_v56, %v267_v55  ;;  %v291_v15 = vsel %vm290_vm2, 1, %v482_v46  ;;  %v296_v13 = vmul.u32 %v536_v37, %v242_v9 }
  0x48   :  { %v293_v62 = vadd.s32 %v291_v15, %v289_v58  ;;  %v142_v46 = vadd.s32 %v598_v59, %v612_v6  ;;  %v172_v42 = vsub.s32 4, %v639_v49  ;;  %vm50_vm7 = vcmp.lt.s32.totalorder %v513_v3, 0 }
  0x49   :  { %vm151_vm3 = vcmp.lt.s32.totalorder %v150_v60, 0  ;;  %v152_v43 = vsub.s32 0, %v150_v60  ;;  %v272_v2 = vadd.s32 %v271_v34, %v261_v14  ;;  %vm661_vm8 = vcmp.le.f32.partialorder %v48_v5, 0.7853982 }
  0x4a   :  { %v294_v23 = vadd.s32 %v293_v62, %v283_v57  ;;  %v173_v26 = vsel %vm50_vm7, %v172_v42, %v639_v49  ;;  %vm205_vm11 = vcmp.lt.s32.totalorder %v516_v4, 0  ;;  %vm677_vm13 = vcmp.le.f32.partialorder %v203_v7, 0.7853982 }
  0x4b   :  { %v153_v63 = vsel %vm151_vm3, %v152_v43, %v150_v60  ;;  %v273_v10 = vadd.s32 %v272_v2, %v263_v24  ;;  %v175_v52 = vsel %vm661_vm8, 0, %v173_v26  ;;  %vm191_vm15 = vweird.f32 %v513_v3 }
  0x4c   :  { %v154_v11 = vclz %v153_v63  ;;  %v295_v12 = vadd.s32 %v294_v23, %v285_v61  ;;  %vm346_vm3 = vweird.f32 %v516_v4 }
  0x4d   :  { %vm298_vm4 = vc.u32 %v273_v10, %v292_v8  ;;  %v297_v51 = vadd.s32 %v292_v8, %v273_v10 }
  0x4e   :  { %v389_v16 = vadd.s32 4294967294, %v154_v11  ;;  %v299_v17 = vadd.s32 1, %v295_v12 }
  0x50   :  { %vm390_vm5 = vcmp.lt.s32.totalorder %v389_v16, 0  ;;  %v300_v18 = vsel %vm298_vm4, %v299_v17, %v295_v12 }
  0x51   :  { %v157_v20 = vsel %vm390_vm5, 0, %v389_v16  ;;  %v301_v21 = vadd.s32 %v300_v18, %v296_v13 }
  0x52   :  { %v158_v22 = vsub.s32 32, %v157_v20  ;;  %v159_v54 = vshll.u32 %v150_v60, %v157_v20  ;;  %v162_v25 = vsub.s32 4294967266, %v157_v20  ;;  %v192_v60 = vadd.s32 3, %v175_v52 }
  0x53   :  { %v302_v27 = vadd.s32 536870912, %v301_v21 }
  0x54   :  { %v160_v28 = vshrl.u32 %v142_v46, %v158_v22  ;;  %v163_v29 = vadd.s32 127, %v162_v25  ;;  %v193_v8 = vand.u32 3, %v192_v60 }
  0x55   :  { %v654_v19 = vshrl.u32 %v302_v27, 30 }
  0x56   :  { %v161_v31 = vor.u32 %v160_v28, %v159_v54  ;;  %v164_v37 = vshll.u32 %v163_v29, 23  ;;  %vm198_vm10 = vcmp.eq.s32.totalorder %v193_v8, 2  ;;  %vm195_vm12 = vcmp.eq.s32.totalorder %v193_v8, 0 }
  0x57   :  { %v304_v33 = vshll.u32 %v654_v19, 30  ;;  %v327_v18 = vsub.s32 4, %v654_v19  ;;  %vm194_vm14 = vcmp.lt.s32.totalorder %v193_v8, 2 }
  0x58   :  { %v165_v35 = vor.u32 4788187, %v164_v37  ;;  %v168_v38 = vcvt.s32.f32 %v161_v31 }
  0x59   :  { %v305_v39 = vsub.s32 %v301_v21, %v304_v33  ;;  %v328_v28 = vsel %vm205_vm11, %v327_v18, %v654_v19  ;;  %v360_v33 = vstv %s671_s1 }
  0x5a   :  { %v166_v59 = vand.u32 2147483647, %v165_v35  ;;  %v330_v35 = vsel %vm677_vm13, 0, %v328_v28 }
  0x5b   :  { %vm306_vm6 = vcmp.lt.s32.totalorder %v305_v39, 0  ;;  %v307_v6 = vsub.s32 0, %v305_v39  ;;  %v347_v42 = vadd.s32 3, %v330_v35 }
  0x5c   :  { %v169_v40 = vmul.f32 %v168_v38, %v166_v59 }
  0x5d   :  { %v308_v30 = vsel %vm306_vm6, %v307_v6, %v305_v39 }
  0x5e   :  { %v170_v45 = vxor.u32 2147483648, %v169_v40  ;;  %v309_v47 = vclz %v308_v30 }
  0x60   :  { %v171_v36 = vsel %vm50_vm7, %v170_v45, %v169_v40  ;;  %v392_v48 = vadd.s32 4294967294, %v309_v47 }
  0x61   :  { %v174_v50 = vsel %vm661_vm8, %v513_v3, %v171_v36  ;;  %v348_v36 = vand.u32 3, %v347_v42 }
  0x62   :  { %v176_v41 = vmul.f32 %v174_v50, %v174_v50  ;;  %vm393_vm9 = vcmp.lt.s32.totalorder %v392_v48, 0 }
  0x63   :  { %v312_v5 = vsel %vm393_vm9, 0, %v392_v48  ;;  %vm353_vm0 = vcmp.eq.s32.totalorder %v348_v36, 2  ;;  %vm350_vm1 = vcmp.eq.s32.totalorder %v348_v36, 0  ;;  %vm349_vm2 = vcmp.lt.s32.totalorder %v348_v36, 2 }
  0x64   :  { %v177_v53 = vmul.f32 -0.001358992, %v176_v41  ;;  %v184_v32 = vmul.f32 -0.00019511016, %v176_v41  ;;  %v313_v14 = vsub.s32 32, %v312_v5  ;;  %v314_v55 = vshll.u32 %v305_v39, %v312_v5 }
  0x65   :  { %v317_v56 = vsub.s32 4294967266, %v312_v5 }
  0x66   :  { %v178_v57 = vadd.f32 0.041655596, %v177_v53  ;;  %v185_v58 = vadd.f32 0.008332121, %v184_v32  ;;  %v315_v49 = vshrl.u32 %v297_v51, %v313_v14 }
  0x67   :  { %v318_v24 = vadd.s32 127, %v317_v56 }
  0x68   :  { %v179_v34 = vmul.f32 %v178_v57, %v176_v41  ;;  %v186_v15 = vmul.f32 %v185_v58, %v176_v41  ;;  %v316_v61 = vor.u32 %v315_v49, %v314_v55 }
  0x69   :  { %v319_v62 = vshll.u32 %v318_v24, 23 }
  0x6a   :  { %v180_v43 = vadd.f32 -0.4999988, %v179_v34  ;;  %v187_v2 = vadd.f32 -0.16666654, %v186_v15  ;;  %v323_v23 = vcvt.s32.f32 %v316_v61 }
  0x6b   :  { %v320_v9 = vor.u32 4788187, %v319_v62 }
  0x6c   :  { %v181_v63 = vmul.f32 %v180_v43, %v176_v41  ;;  %v188_v10 = vmul.f32 %v187_v2, %v176_v41 }
  0x6d   :  { %v321_v11 = vand.u32 2147483647, %v320_v9 }
  0x6e   :  { %v182_v12 = vadd.f32 1.0, %v181_v63  ;;  %v189_v13 = vadd.f32 1.0, %v188_v10 }
  0x6f   :  { %v324_v16 = vmul.f32 %v323_v23, %v321_v11 }
  0x70   :  { %v190_v17 = vmul.f32 %v189_v13, %v174_v50  ;;  %v199_v46 = vxor.u32 2147483648, %v182_v12 }
  0x71   :  { %v325_v21 = vxor.u32 2147483648, %v324_v16 }
  0x72   :  { %v196_v22 = vxor.u32 2147483648, %v190_v17  ;;  %v200_v54 = vsel %vm198_vm10, %v199_v46, %v190_v17 }
  0x73   :  { %v326_v25 = vsel %vm205_vm11, %v325_v21, %v324_v16 }
  0x74   :  { %v197_v27 = vsel %vm195_vm12, %v182_v12, %v196_v22  ;;  %v329_v29 = vsel %vm677_vm13, %v516_v4, %v326_v25 }
  0x75   :  { %v201_v31 = vsel %vm194_vm14, %v197_v27, %v200_v54  ;;  %v331_v37 = vmul.f32 %v329_v29, %v329_v29 }
  0x76   :  { %v202_v7 = vsel %vm191_vm15, nan, %v201_v31 }
  0x77   :  { %v332_v38 = vmul.f32 -0.001358992, %v331_v37  ;;  %v339_v39 = vmul.f32 -0.00019511016, %v331_v37  ;;  %v358_v59 = vmul.f32 %v202_v7, %v202_v7 }
  0x79   :  { %v333_v6 = vadd.f32 0.041655596, %v332_v38  ;;  %v340_v3 = vadd.f32 0.008332121, %v339_v39  ;;  %v361_v40 = vmul.f32 %v360_v33, %v358_v59 }
  0x7b   :  { %v334_v30 = vmul.f32 %v333_v6, %v331_v37  ;;  %v341_v19 = vmul.f32 %v340_v3, %v331_v37  ;;  %v363_v44 = vadd.f32 %v361_v40, %v508_v0 }
  0x7d   :  { %v335_v45 = vadd.f32 -0.4999988, %v334_v30  ;;  %v342_v47 = vadd.f32 -0.16666654, %v341_v19  ;;  %365 = vst [vmem:[#allocation7] sm:$0xff] %v363_v44 }
  0x7f   :  { %v336_v26 = vmul.f32 %v335_v45, %v331_v37  ;;  %v343_v48 = vmul.f32 %v342_v47, %v331_v37 }
  0x81   :  { %v337_v50 = vadd.f32 1.0, %v336_v26  ;;  %v344_v41 = vadd.f32 1.0, %v343_v48 }
  0x83   :  { %v345_v51 = vmul.f32 %v344_v41, %v329_v29  ;;  %v354_v52 = vxor.u32 2147483648, %v337_v50 }
  0x85   :  { %v351_v5 = vxor.u32 2147483648, %v345_v51  ;;  %v355_v53 = vsel %vm353_vm0, %v354_v52, %v345_v51 }
  0x87   :  { %v352_v32 = vsel %vm350_vm1, %v337_v50, %v351_v5 }
  0x88   :  { %v356_v14 = vsel %vm349_vm2, %v352_v32, %v355_v53 }
  0x89   :  { %v357_v0 = vsel %vm346_vm3, nan, %v356_v14 }
  0x8a   :  { %v359_v55 = vmul.f32 %v357_v0, %v357_v0 }
  0x8c   :  { %v362_v56 = vmul.f32 %v360_v33, %v359_v55 }
  0x8e   :  { %v364_v57 = vadd.f32 %v362_v56, %v510_v1 }
  0x90   :  { %366 = vst [vmem:[#allocation7 + $0x8] sm:$0xff] %v364_v57 }
  0x91   :  { %379 = dma.vmem_to_hbm [thread:$0]  %s372_s21, 256, %s374_s24, [#allocation4], %s474_s18, %s474_s18, %s475_s19  }
  0x92   :  { %470 = dma.done.wait [#allocation4], 256  }
  0x93   :  { %471 = vsyncadd [#allocation4], 4294967040 }
  0x94   :  { %384 = vsyncpa [#allocation3], 1 }
  0x95   :  { %385 = vsyncpa [#allocation4], 1 }
  0x96   :  { %386 = vsyncpa [#allocation5], 1 }

</bundles_post_ra>
